<compile_context>
chip_gen: v7x
topology: tpu7x:2x2x1
jax: 0.10.0
libtpu: 0.0.40
codegen_flags: <defaults>
</compile_context>

<pallas_src>
import functools

import jax
import jax.numpy as jnp
from jax.experimental import pallas as pl
from jax.experimental.pallas import tpu as pltpu


def _pick_tile(dim, max_tile, align):
    """Largest tile <= max_tile that divides `dim` and is a multiple of
    `align`; falls back to the full dimension (always BlockSpec-legal)."""
    if dim <= max_tile:
        return dim
    t = (max_tile // align) * align
    while t >= align:
        if dim % t == 0:
            return t
        t -= align
    return dim


def _mha_flash_kernel(scale, hd_k, hd_v,
                      xq_ref, xm_ref, bias_ref, wq_ref, wkv_ref, wo_ref,
                      out_ref,
                      q_sc, m_sc, l_sc, acc_sc):
    """One grid step == (batch b, q-tile qi, head h, kv-tile ki).

    xq_ref:   [1, tq, key_depth]        bf16
    xm_ref:   [1, tk, mem_depth]        bf16
    bias_ref: [1, tq, tk]               f32 additive logits mask
    wq_ref:   [hd_k, key_depth]         bf16, this head's Q rows
    wkv_ref:  [hd_k + hd_v, mem_depth]  bf16, this head's K rows then V rows
    wo_ref:   [hd_v, out_depth]         bf16, this head's slice of Wo^T
    out_ref:  [1, tq, out_depth]        f32, accumulated over heads
    """
    h = pl.program_id(2)
    ki = pl.program_id(3)
    nk = pl.num_programs(3)

    @pl.when(ki == 0)
    def _init():
        # Per-head Q projection of this q tile: xq @ Wq[h].T
        # (contract last dims of both operands -> no in-kernel transpose).
        q = jax.lax.dot_general(
            xq_ref[0], wq_ref[...],
            dimension_numbers=(((1,), (1,)), ((), ())),
            preferred_element_type=jnp.float32)
        q_sc[...] = (q * scale).astype(q_sc.dtype)
        m_sc[...] = jnp.full_like(m_sc, -jnp.inf)
        l_sc[...] = jnp.zeros_like(l_sc)
        acc_sc[...] = jnp.zeros_like(acc_sc)

    # Fused K/V projection of this kv tile: xm @ [Wk[h]; Wv[h]].T  -> one
    # matmul with doubled N instead of two narrow ones.
    kv = jax.lax.dot_general(
        xm_ref[0], wkv_ref[...],
        dimension_numbers=(((1,), (1,)), ((), ())),
        preferred_element_type=jnp.float32)          # [tk, hd_k + hd_v]
    k = kv[:, :hd_k].astype(jnp.bfloat16)
    v = kv[:, hd_k:].astype(jnp.bfloat16)

    # logits = q @ k.T + bias  (contract head_dim; f32 accumulation).
    s = jax.lax.dot_general(
        q_sc[...], k,
        dimension_numbers=(((1,), (1,)), ((), ())),
        preferred_element_type=jnp.float32)
    s = s + bias_ref[0]

    # Online softmax update (all f32 on the VPU/EUP).
    m_prev = m_sc[...]
    m_new = jnp.maximum(m_prev, jnp.max(s, axis=-1, keepdims=True))
    alpha = jnp.exp(m_prev - m_new)
    p = jnp.exp(s - m_new)
    l_sc[...] = alpha * l_sc[...] + jnp.sum(p, axis=-1, keepdims=True)
    acc_sc[...] = alpha * acc_sc[...] + jnp.dot(
        p.astype(jnp.bfloat16), v, preferred_element_type=jnp.float32)
    m_sc[...] = m_new

    @pl.when(ki == nk - 1)
    def _finalize():
        # Normalize with the EUP reciprocal (frees VALU slots) and fold this
        # head straight into the output projection: out += (acc/l) @ Wo^T[h].
        head_out = acc_sc[...] * pl.reciprocal(l_sc[...], approx=True)
        contrib = jnp.dot(head_out.astype(jnp.bfloat16), wo_ref[...],
                          preferred_element_type=jnp.float32)

        @pl.when(h == 0)
        def _():
            out_ref[0] = contrib.astype(out_ref.dtype)

        @pl.when(h > 0)
        def _():
            out_ref[0] = out_ref[0] + contrib.astype(out_ref.dtype)


def multihead_attention(query_antecedent, memory_antecedent, bias,
                        wq, wk, wv, wo, num_heads,
                        *, q_tile_max=128, kv_tile_max=512):
    """Pallas MultiheadAttention forward (to_weights=False).

    query_antecedent:  [B, Tq, key_depth]
    memory_antecedent: [B, Tk, mem_depth] or None (self-attention)
    bias:              [B or 1, Tq, Tk] additive logits mask (or None)
    wq, wk, wv, wo:    PyTorch Linear layout [out_features, in_features]
    """
    if memory_antecedent is None:
        memory_antecedent = query_antecedent

    B, Tq, key_depth = query_antecedent.shape
    Bm, Tk, mem_depth = memory_antecedent.shape
    assert Bm == B
    key_dim = wq.shape[0]
    value_dim = wv.shape[0]
    out_depth = wo.shape[0]
    assert wq.shape == (key_dim, key_depth)
    assert wk.shape == (key_dim, mem_depth)
    assert wv.shape == (value_dim, mem_depth)
    assert wo.shape == (out_depth, value_dim)
    assert key_dim % num_heads == 0 and value_dim % num_heads == 0
    hd_k = key_dim // num_heads
    hd_v = value_dim // num_heads
    assert hd_k % 8 == 0 and hd_v % 8 == 0, "head dims must be 8-aligned"
    scale = float(hd_k) ** -0.5

    if bias is None:
        bias = jnp.zeros((B, Tq, Tk), jnp.float32)
    bias = jnp.broadcast_to(bias.astype(jnp.float32), (B, Tq, Tk))

    # One-time wrapper-side packing: K and V rows interleaved head-major so a
    # single BlockSpec row-block == one head's fused K/V projection weights;
    # Wo transposed once so the kernel contracts without relayouts.  All MXU
    # operands cast to bf16 (f32 accumulation is kept in-kernel).
    wkv = jnp.concatenate(
        [wk.reshape(num_heads, hd_k, mem_depth),
         wv.reshape(num_heads, hd_v, mem_depth)], axis=1,
    ).reshape(num_heads * (hd_k + hd_v), mem_depth)
    xq_b = query_antecedent.astype(jnp.bfloat16)
    xm_b = memory_antecedent.astype(jnp.bfloat16)
    wq_b = wq.astype(jnp.bfloat16)
    wkv_b = wkv.astype(jnp.bfloat16)
    wo_t_b = wo.T.astype(jnp.bfloat16)               # [value_dim, out_depth]

    # Flash tiles: q tiles sublane-aligned (8), kv tiles lane-aligned (128) so
    # bias/logits blocks stay (8,128)-legal; sizes fit the 32 MiB scoped VMEM
    # default on every generation (incl. v7x's 64 MiB physical VMEM).
    tq = _pick_tile(Tq, q_tile_max, 8)
    tk = _pick_tile(Tk, kv_tile_max, 128)
    nq, nk = Tq // tq, Tk // tk

    kernel = functools.partial(_mha_flash_kernel, scale, hd_k, hd_v)

    # Advisory cost hint for XLA scheduling (K/V projection is recomputed per
    # q tile by design; NOTE: out_depth < 128 lowers to masked stores — pad
    # the model dim to a multiple of 128 for production sizes).
    flops = 2.0 * B * (Tq * key_depth * key_dim
                       + nq * Tk * mem_depth * (key_dim + value_dim)
                       + num_heads * Tq * Tk * (hd_k + hd_v)
                       + Tq * value_dim * out_depth)
    transcendentals = B * num_heads * Tq * Tk
    bytes_accessed = (xq_b.size * 2 * num_heads
                      + xm_b.size * 2 * num_heads * nq
                      + bias.size * 4 * num_heads
                      + (wq_b.size + wkv_b.size + wo_t_b.size) * 2 * B * nq
                      + B * Tq * out_depth * 4)

    # TODO(synk): to_weights=True (returning averaged attention weights) is
    # not implemented; only the default forward path is reproduced.
    return pl.pallas_call(
        kernel,
        out_shape=jax.ShapeDtypeStruct((B, Tq, out_depth), jnp.float32),
        grid_spec=pltpu.PrefetchScalarGridSpec(
            num_scalar_prefetch=0,
            grid=(B, nq, num_heads, nk),
            in_specs=[
                pl.BlockSpec((1, tq, key_depth), lambda b, qi, h, ki: (b, qi, 0)),
                pl.BlockSpec((1, tk, mem_depth), lambda b, qi, h, ki: (b, ki, 0)),
                pl.BlockSpec((1, tq, tk), lambda b, qi, h, ki: (b, qi, ki)),
                pl.BlockSpec((hd_k, key_depth), lambda b, qi, h, ki: (h, 0)),
                pl.BlockSpec((hd_k + hd_v, mem_depth), lambda b, qi, h, ki: (h, 0)),
                pl.BlockSpec((hd_v, out_depth), lambda b, qi, h, ki: (h, 0)),
            ],
            out_specs=pl.BlockSpec((1, tq, out_depth),
                                   lambda b, qi, h, ki: (b, qi, 0)),
            scratch_shapes=[
                pltpu.VMEM((tq, hd_k), jnp.bfloat16),   # scaled q (per head)
                pltpu.VMEM((tq, 1), jnp.float32),       # running max
                pltpu.VMEM((tq, 1), jnp.float32),       # running denominator
                pltpu.VMEM((tq, hd_v), jnp.float32),    # running numerator
            ],
        ),
        compiler_params=pltpu.CompilerParams(
            dimension_semantics=("parallel", "parallel", "arbitrary",
                                 "arbitrary")),
        cost_estimate=pl.CostEstimate(
            flops=int(flops),
            transcendentals=int(transcendentals),
            bytes_accessed=int(bytes_accessed)),
    )(xq_b, xm_b, bias, wq_b, wkv_b, wo_t_b)


def _reference(query_antecedent, memory_antecedent, bias,
               wq, wk, wv, wo, num_heads):
    """Plain-JAX f32 reference mirroring the PyTorch forward (to_weights=False)."""
    if memory_antecedent is None:
        memory_antecedent = query_antecedent
    key_dim = wq.shape[0]
    value_dim = wv.shape[0]
    hd_k = key_dim // num_heads
    hd_v = value_dim // num_heads
    q = query_antecedent @ wq.T * (hd_k ** -0.5)
    k = memory_antecedent @ wk.T
    v = memory_antecedent @ wv.T
    outs = []
    for h in range(num_heads):
        logits = jnp.einsum('btd,bsd->bts',
                            q[..., h * hd_k:(h + 1) * hd_k],
                            k[..., h * hd_k:(h + 1) * hd_k]) + bias
        w = jax.nn.softmax(logits, axis=-1)
        outs.append(jnp.einsum('bts,bsd->btd', w,
                               v[..., h * hd_v:(h + 1) * hd_v]))
    return jnp.concatenate(outs, axis=-1) @ wo.T


if __name__ == "__main__":
    # Module hyperparameters (rank_scale=0 => key_dim=key_depth, value_dim=value_depth)
    key_depth = 32
    value_depth = 32
    output_depth = 32
    num_heads = 4

    B, Tq, Tk = 2, 8, 16

    key = jax.random.PRNGKey(0)
    k_xq, k_xm, k_b, k_wq, k_wk, k_wv, k_wo = jax.random.split(key, 7)

    # Deterministic parameter init matching uniform_(-0.1, 0.1)
    wq = jax.random.uniform(k_wq, (key_depth, key_depth), jnp.float32, -0.1, 0.1)
    wk = jax.random.uniform(k_wk, (key_depth, key_depth), jnp.float32, -0.1, 0.1)
    wv = jax.random.uniform(k_wv, (value_depth, value_depth), jnp.float32, -0.1, 0.1)
    wo = jax.random.uniform(k_wo, (output_depth, value_depth), jnp.float32, -0.1, 0.1)

    # Inputs: [batch, seq, features]; additive attention bias [batch, Tq, Tk]
    query_antecedent = jax.random.normal(k_xq, (B, Tq, key_depth), jnp.float32)
    memory_antecedent = jax.random.normal(k_xm, (B, Tk, key_depth), jnp.float32)
    attn_bias = jnp.where(
        jax.random.uniform(k_b, (B, Tq, Tk)) < 0.2, -1e9, 0.0).astype(jnp.float32)

    out = multihead_attention(query_antecedent, memory_antecedent, attn_bias,
                              wq, wk, wv, wo, num_heads)
    out = jax.block_until_ready(out)

    ref = _reference(query_antecedent, memory_antecedent, attn_bias,
                     wq, wk, wv, wo, num_heads)
    assert out.shape == (B, Tq, output_depth)
    # bf16 MXU operands with f32 accumulation -> relaxed tolerance vs f32 ref.
    assert jnp.allclose(out, ref, atol=3e-2, rtol=3e-2), "mismatch vs reference"

    print("KERNEL_OK")
</pallas_src>

<mosaic_0001>
module attributes {stable_mosaic.version = 11 : i64} {
  func.func @_mha_flash_kernel(%arg0: i32, %arg1: i32, %arg2: i32, %arg3: i32, %arg4: memref<1x8x32xbf16, #tpu.memory_space<vmem>>, %arg5: memref<1x16x32xbf16, #tpu.memory_space<vmem>>, %arg6: memref<1x8x16xf32, #tpu.memory_space<vmem>>, %arg7: memref<8x32xbf16, #tpu.memory_space<vmem>>, %arg8: memref<16x32xbf16, #tpu.memory_space<vmem>>, %arg9: memref<8x32xbf16, #tpu.memory_space<vmem>>, %arg10: memref<1x8x32xf32, #tpu.memory_space<vmem>>, %arg11: memref<8x8xbf16, #tpu.memory_space<vmem>>, %arg12: memref<8x1xf32, #tpu.memory_space<vmem>>, %arg13: memref<8x1xf32, #tpu.memory_space<vmem>>, %arg14: memref<8x8xf32, #tpu.memory_space<vmem>>) attributes {dimension_semantics = [#tpu.dimension_semantics<parallel>, #tpu.dimension_semantics<parallel>, #tpu.dimension_semantics<arbitrary>, #tpu.dimension_semantics<arbitrary>], iteration_bounds = array<i64: 2, 1, 4, 1>, scalar_prefetch = 0 : i64, scratch_operands = 4 : i64, tpu.core_type = #tpu.core_type<tc>, window_params = [{transform_indices = @transform_0, window_bounds = array<i64: 1, 8, 32>}, {transform_indices = @transform_1, window_bounds = array<i64: 1, 16, 32>}, {transform_indices = @transform_2, window_bounds = array<i64: 1, 8, 16>}, {transform_indices = @transform_3, window_bounds = array<i64: 8, 32>}, {transform_indices = @transform_4, window_bounds = array<i64: 16, 32>}, {transform_indices = @transform_5, window_bounds = array<i64: 8, 32>}, {transform_indices = @transform_6, window_bounds = array<i64: 1, 8, 32>}]} {
    %c0_i32 = arith.constant 0 : i32
    %0 = arith.cmpi eq, %arg3, %c0_i32 : i32
    %1 = arith.extui %0 : i1 to i32
    %c0_i32_0 = arith.constant 0 : i32
    %2 = arith.cmpi ne, %1, %c0_i32_0 : i32
    scf.if %2 {
      %c0_28 = arith.constant 0 : index
      %c0_29 = arith.constant 0 : index
      %c0_30 = arith.constant 0 : index
      %42 = vector.load %arg4[%c0_28, %c0_29, %c0_30] : memref<1x8x32xbf16, #tpu.memory_space<vmem>>, vector<1x8x32xbf16>
      %43 = vector.shape_cast %42 : vector<1x8x32xbf16> to vector<8x32xbf16>
      %c0_31 = arith.constant 0 : index
      %c0_32 = arith.constant 0 : index
      %44 = vector.load %arg7[%c0_31, %c0_32] : memref<8x32xbf16, #tpu.memory_space<vmem>>, vector<8x32xbf16>
      %cst_33 = arith.constant dense<0.000000e+00> : vector<8x8xf32>
      %45 = tpu.matmul %43, %44, %cst_33 {dimension_numbers = #tpu.dot_dimension_numbers<[1], [1], [0], [0], [0, 0, 1, 0], [], []>} : vector<8x32xbf16>, vector<8x32xbf16>, vector<8x8xf32> -> vector<8x8xf32>
      %cst_34 = arith.constant 0.353553385 : f32
      %46 = vector.broadcast %cst_34 : f32 to vector<8x8xf32>
      %47 = arith.mulf %45, %46 : vector<8x8xf32>
      %48 = arith.truncf %47 : vector<8x8xf32> to vector<8x8xbf16>
      %c0_35 = arith.constant 0 : index
      %c0_36 = arith.constant 0 : index
      %49 = vector.load %arg11[%c0_35, %c0_36] : memref<8x8xbf16, #tpu.memory_space<vmem>>, vector<8x8xbf16>
      tpu.vector_store %arg11[%c0_35, %c0_36], %48 {strides = array<i32>} : memref<8x8xbf16, #tpu.memory_space<vmem>>, vector<8x8xbf16>,
      %cst_37 = arith.constant 0xFF800000 : f32
      %50 = vector.broadcast %cst_37 : f32 to vector<8x1xf32>
      %c0_38 = arith.constant 0 : index
      %c0_39 = arith.constant 0 : index
      %51 = vector.load %arg12[%c0_38, %c0_39] : memref<8x1xf32, #tpu.memory_space<vmem>>, vector<8x1xf32>
      tpu.vector_store %arg12[%c0_38, %c0_39], %50 {strides = array<i32>} : memref<8x1xf32, #tpu.memory_space<vmem>>, vector<8x1xf32>,
      %cst_40 = arith.constant 0.000000e+00 : f32
      %52 = vector.broadcast %cst_40 : f32 to vector<8x1xf32>
      %c0_41 = arith.constant 0 : index
      %c0_42 = arith.constant 0 : index
      %53 = vector.load %arg13[%c0_41, %c0_42] : memref<8x1xf32, #tpu.memory_space<vmem>>, vector<8x1xf32>
      tpu.vector_store %arg13[%c0_41, %c0_42], %52 {strides = array<i32>} : memref<8x1xf32, #tpu.memory_space<vmem>>, vector<8x1xf32>,
      %cst_43 = arith.constant 0.000000e+00 : f32
      %54 = vector.broadcast %cst_43 : f32 to vector<8x8xf32>
      %c0_44 = arith.constant 0 : index
      %c0_45 = arith.constant 0 : index
      %55 = vector.load %arg14[%c0_44, %c0_45] : memref<8x8xf32, #tpu.memory_space<vmem>>, vector<8x8xf32>
      tpu.vector_store %arg14[%c0_44, %c0_45], %54 {strides = array<i32>} : memref<8x8xf32, #tpu.memory_space<vmem>>, vector<8x8xf32>,
    } else {
    }
    %c0 = arith.constant 0 : index
    %c0_1 = arith.constant 0 : index
    %c0_2 = arith.constant 0 : index
    %3 = vector.load %arg5[%c0, %c0_1, %c0_2] : memref<1x16x32xbf16, #tpu.memory_space<vmem>>, vector<1x16x32xbf16>
    %4 = vector.shape_cast %3 : vector<1x16x32xbf16> to vector<16x32xbf16>
    %c0_3 = arith.constant 0 : index
    %c0_4 = arith.constant 0 : index
    %5 = vector.load %arg8[%c0_3, %c0_4] : memref<16x32xbf16, #tpu.memory_space<vmem>>, vector<16x32xbf16>
    %cst = arith.constant dense<0.000000e+00> : vector<16x16xf32>
    %6 = tpu.matmul %4, %5, %cst {dimension_numbers = #tpu.dot_dimension_numbers<[1], [1], [0], [0], [0, 0, 1, 0], [], []>} : vector<16x32xbf16>, vector<16x32xbf16>, vector<16x16xf32> -> vector<16x16xf32>
    %7 = vector.extract_strided_slice %6 {offsets = [0, 0], sizes = [16, 8], strides = [1, 1]} : vector<16x16xf32> to vector<16x8xf32>
    %8 = arith.truncf %7 : vector<16x8xf32> to vector<16x8xbf16>
    %9 = vector.extract_strided_slice %6 {offsets = [0, 8], sizes = [16, 8], strides = [1, 1]} : vector<16x16xf32> to vector<16x8xf32>
    %10 = arith.truncf %9 : vector<16x8xf32> to vector<16x8xbf16>
    %c0_5 = arith.constant 0 : index
    %c0_6 = arith.constant 0 : index
    %11 = vector.load %arg11[%c0_5, %c0_6] : memref<8x8xbf16, #tpu.memory_space<vmem>>, vector<8x8xbf16>
    %cst_7 = arith.constant dense<0.000000e+00> : vector<8x16xf32>
    %12 = tpu.matmul %11, %8, %cst_7 {dimension_numbers = #tpu.dot_dimension_numbers<[1], [1], [0], [0], [0, 0, 1, 0], [], []>} : vector<8x8xbf16>, vector<16x8xbf16>, vector<8x16xf32> -> vector<8x16xf32>
    %c0_8 = arith.constant 0 : index
    %c0_9 = arith.constant 0 : index
    %c0_10 = arith.constant 0 : index
    %13 = vector.load %arg6[%c0_8, %c0_9, %c0_10] : memref<1x8x16xf32, #tpu.memory_space<vmem>>, vector<1x8x16xf32>
    %14 = vector.shape_cast %13 : vector<1x8x16xf32> to vector<8x16xf32>
    %15 = arith.addf %12, %14 : vector<8x16xf32>
    %c0_11 = arith.constant 0 : index
    %c0_12 = arith.constant 0 : index
    %16 = vector.load %arg12[%c0_11, %c0_12] : memref<8x1xf32, #tpu.memory_space<vmem>>, vector<8x1xf32>
    %cst_13 = arith.constant dense<0xFF800000> : vector<8xf32>
    %17 = vector.multi_reduction <maximumf>, %15, %cst_13 [1] : vector<8x16xf32> to vector<8xf32>
    %18 = vector.shape_cast %17 : vector<8xf32> to vector<8x1xf32>
    %19 = arith.maximumf %16, %18 : vector<8x1xf32>
    %20 = arith.subf %16, %19 : vector<8x1xf32>
    %21 = math.exp %20 : vector<8x1xf32>
    %22 = vector.broadcast %19 : vector<8x1xf32> to vector<8x16xf32>
    %23 = arith.subf %15, %22 : vector<8x16xf32>
    %24 = math.exp %23 : vector<8x16xf32>
    %c0_14 = arith.constant 0 : index
    %c0_15 = arith.constant 0 : index
    %25 = vector.load %arg13[%c0_14, %c0_15] : memref<8x1xf32, #tpu.memory_space<vmem>>, vector<8x1xf32>
    %26 = arith.mulf %21, %25 : vector<8x1xf32>
    %cst_16 = arith.constant dense<0.000000e+00> : vector<8xf32>
    %27 = vector.multi_reduction <add>, %24, %cst_16 [1] : vector<8x16xf32> to vector<8xf32>
    %28 = vector.shape_cast %27 : vector<8xf32> to vector<8x1xf32>
    %29 = arith.addf %26, %28 : vector<8x1xf32>
    %c0_17 = arith.constant 0 : index
    %c0_18 = arith.constant 0 : index
    %30 = vector.load %arg13[%c0_17, %c0_18] : memref<8x1xf32, #tpu.memory_space<vmem>>, vector<8x1xf32>
    tpu.vector_store %arg13[%c0_17, %c0_18], %29 {strides = array<i32>} : memref<8x1xf32, #tpu.memory_space<vmem>>, vector<8x1xf32>,
    %c0_19 = arith.constant 0 : index
    %c0_20 = arith.constant 0 : index
    %31 = vector.load %arg14[%c0_19, %c0_20] : memref<8x8xf32, #tpu.memory_space<vmem>>, vector<8x8xf32>
    %32 = vector.broadcast %21 : vector<8x1xf32> to vector<8x8xf32>
    %33 = arith.mulf %32, %31 : vector<8x8xf32>
    %34 = arith.truncf %24 : vector<8x16xf32> to vector<8x16xbf16>
    %cst_21 = arith.constant dense<0.000000e+00> : vector<8x8xf32>
    %35 = tpu.matmul %34, %10, %cst_21 {dimension_numbers = #tpu.dot_dimension_numbers<[1], [0], [0], [1], [0, 0, 1, 1], [], []>} : vector<8x16xbf16>, vector<16x8xbf16>, vector<8x8xf32> -> vector<8x8xf32>
    %36 = arith.addf %33, %35 : vector<8x8xf32>
    %c0_22 = arith.constant 0 : index
    %c0_23 = arith.constant 0 : index
    %37 = vector.load %arg14[%c0_22, %c0_23] : memref<8x8xf32, #tpu.memory_space<vmem>>, vector<8x8xf32>
    tpu.vector_store %arg14[%c0_22, %c0_23], %36 {strides = array<i32>} : memref<8x8xf32, #tpu.memory_space<vmem>>, vector<8x8xf32>,
    %c0_24 = arith.constant 0 : index
    %c0_25 = arith.constant 0 : index
    %38 = vector.load %arg12[%c0_24, %c0_25] : memref<8x1xf32, #tpu.memory_space<vmem>>, vector<8x1xf32>
    tpu.vector_store %arg12[%c0_24, %c0_25], %19 {strides = array<i32>} : memref<8x1xf32, #tpu.memory_space<vmem>>, vector<8x1xf32>,
    %c0_i32_26 = arith.constant 0 : i32
    %39 = arith.cmpi eq, %arg3, %c0_i32_26 : i32
    %40 = arith.extui %39 : i1 to i32
    %c0_i32_27 = arith.constant 0 : i32
    %41 = arith.cmpi ne, %40, %c0_i32_27 : i32
    scf.if %41 {
      %c0_28 = arith.constant 0 : index
      %c0_29 = arith.constant 0 : index
      %42 = vector.load %arg14[%c0_28, %c0_29] : memref<8x8xf32, #tpu.memory_space<vmem>>, vector<8x8xf32>
      %c0_30 = arith.constant 0 : index
      %c0_31 = arith.constant 0 : index
      %43 = vector.load %arg13[%c0_30, %c0_31] : memref<8x1xf32, #tpu.memory_space<vmem>>, vector<8x1xf32>
      %44 = tpu.reciprocal %43 {approx = true} : vector<8x1xf32> -> vector<8x1xf32>
      %45 = vector.broadcast %44 : vector<8x1xf32> to vector<8x8xf32>
      %46 = arith.mulf %42, %45 : vector<8x8xf32>
      %47 = arith.truncf %46 : vector<8x8xf32> to vector<8x8xbf16>
      %c0_32 = arith.constant 0 : index
      %c0_33 = arith.constant 0 : index
      %48 = vector.load %arg9[%c0_32, %c0_33] : memref<8x32xbf16, #tpu.memory_space<vmem>>, vector<8x32xbf16>
      %cst_34 = arith.constant dense<0.000000e+00> : vector<8x32xf32>
      %49 = tpu.matmul %47, %48, %cst_34 {dimension_numbers = #tpu.dot_dimension_numbers<[1], [0], [0], [1], [0, 0, 1, 1], [], []>} : vector<8x8xbf16>, vector<8x32xbf16>, vector<8x32xf32> -> vector<8x32xf32>
      %c0_i32_35 = arith.constant 0 : i32
      %50 = arith.cmpi eq, %arg2, %c0_i32_35 : i32
      %51 = arith.extui %50 : i1 to i32
      %c0_i32_36 = arith.constant 0 : i32
      %52 = arith.cmpi ne, %51, %c0_i32_36 : i32
      scf.if %52 {
        %c0_39 = arith.constant 0 : index
        %c0_40 = arith.constant 0 : index
        %c0_41 = arith.constant 0 : index
        %56 = vector.load %arg10[%c0_39, %c0_40, %c0_41] : memref<1x8x32xf32, #tpu.memory_space<vmem>>, vector<1x8x32xf32>
        %57 = vector.shape_cast %56 : vector<1x8x32xf32> to vector<8x32xf32>
        %58 = vector.shape_cast %49 : vector<8x32xf32> to vector<1x8x32xf32>
        tpu.vector_store %arg10[%c0_39, %c0_40, %c0_41], %58 {strides = array<i32>} : memref<1x8x32xf32, #tpu.memory_space<vmem>>, vector<1x8x32xf32>,
      } else {
      }
      %c0_i32_37 = arith.constant 0 : i32
      %53 = arith.cmpi sgt, %arg2, %c0_i32_37 : i32
      %54 = arith.extui %53 : i1 to i32
      %c0_i32_38 = arith.constant 0 : i32
      %55 = arith.cmpi ne, %54, %c0_i32_38 : i32
      scf.if %55 {
        %c0_39 = arith.constant 0 : index
        %c0_40 = arith.constant 0 : index
        %c0_41 = arith.constant 0 : index
        %56 = vector.load %arg10[%c0_39, %c0_40, %c0_41] : memref<1x8x32xf32, #tpu.memory_space<vmem>>, vector<1x8x32xf32>
        %57 = vector.shape_cast %56 : vector<1x8x32xf32> to vector<8x32xf32>
        %58 = arith.addf %57, %49 : vector<8x32xf32>
        %c0_42 = arith.constant 0 : index
        %c0_43 = arith.constant 0 : index
        %c0_44 = arith.constant 0 : index
        %59 = vector.load %arg10[%c0_42, %c0_43, %c0_44] : memref<1x8x32xf32, #tpu.memory_space<vmem>>, vector<1x8x32xf32>
        %60 = vector.shape_cast %59 : vector<1x8x32xf32> to vector<8x32xf32>
        %61 = vector.shape_cast %58 : vector<8x32xf32> to vector<1x8x32xf32>
        tpu.vector_store %arg10[%c0_42, %c0_43, %c0_44], %61 {strides = array<i32>} : memref<1x8x32xf32, #tpu.memory_space<vmem>>, vector<1x8x32xf32>,
      } else {
      }
    } else {
    }
    return
  }
  func.func @transform_0(%arg0: i32, %arg1: i32, %arg2: i32, %arg3: i32) -> (i32, i32, i32) {
    %c0_i32 = arith.constant 0 : i32
    %c0_i32_0 = arith.constant 0 : i32
    return %arg0, %arg1, %c0_i32 : i32, i32, i32
  }
  func.func @transform_1(%arg0: i32, %arg1: i32, %arg2: i32, %arg3: i32) -> (i32, i32, i32) {
    %c0_i32 = arith.constant 0 : i32
    %c0_i32_0 = arith.constant 0 : i32
    return %arg0, %arg3, %c0_i32 : i32, i32, i32
  }
  func.func @transform_2(%arg0: i32, %arg1: i32, %arg2: i32, %arg3: i32) -> (i32, i32, i32) {
    %c0_i32 = arith.constant 0 : i32
    return %arg0, %arg1, %arg3 : i32, i32, i32
  }
  func.func @transform_3(%arg0: i32, %arg1: i32, %arg2: i32, %arg3: i32) -> (i32, i32) {
    %c0_i32 = arith.constant 0 : i32
    %c0_i32_0 = arith.constant 0 : i32
    return %arg2, %c0_i32 : i32, i32
  }
  func.func @transform_4(%arg0: i32, %arg1: i32, %arg2: i32, %arg3: i32) -> (i32, i32) {
    %c0_i32 = arith.constant 0 : i32
    %c0_i32_0 = arith.constant 0 : i32
    return %arg2, %c0_i32 : i32, i32
  }
  func.func @transform_5(%arg0: i32, %arg1: i32, %arg2: i32, %arg3: i32) -> (i32, i32) {
    %c0_i32 = arith.constant 0 : i32
    %c0_i32_0 = arith.constant 0 : i32
    return %arg2, %c0_i32 : i32, i32
  }
  func.func @transform_6(%arg0: i32, %arg1: i32, %arg2: i32, %arg3: i32) -> (i32, i32, i32) {
    %c0_i32 = arith.constant 0 : i32
    %c0_i32_0 = arith.constant 0 : i32
    return %arg0, %arg1, %c0_i32 : i32, i32, i32
  }
}

</mosaic_0001>

<bundles_post_ra>
// kernel: tpu_custom_call.1
= control target key start
LH: loop header
LB: loop body
LE: loop exit
PB: predicated region body
PF: predicated region fallthrough
CT: control target
= control target key end

     0   :  { %s1520_s0 = inlined_call_operand.hbm [shape: bf16[2,8,32], index: 0, kind: input, shape index: {}]   ;;  %s1521_s1 = inlined_call_operand.vmem [shape: bf16[2,16,32], index: 1, kind: input, shape index: {}]   ;;  %s1522_s2 = inlined_call_operand.vmem [shape: f32[2,8,16], index: 2, kind: input, shape index: {}]   ;;  %s1523_s3 = inlined_call_operand.vmem [shape: bf16[32,32], index: 3, kind: input, shape index: {}]   ;;  %s1524_s4 = inlined_call_operand.vmem [shape: bf16[64,32], index: 4, kind: input, shape index: {}]   ;;  %s1525_s5 = inlined_call_operand.vmem [shape: bf16[32,32], index: 5, kind: input, shape index: {}]   ;;  %s1526_s6 = inlined_call_operand.hbm [shape: f32[2,8,32], index: 6, kind: output, shape index: {}]  }
   0x1   :  { %1530 = sst [smem:[#allocation14_spill]] %s1520_s0 }
   0x2   :  { %11 = vsyncpa [#allocation7], 0 }
   0x3   :  { %13 = vsyncpa [#allocation7 + $0x1], 0 }
   0x4   :  { %14 = vsyncpa [#allocation8], 0 }
   0x5   :  { %16 = vsyncpa [#allocation8 + $0x1], 0  ;;  %s1271_s21 = smov 0   ;;  %s1273_s22 = smov 0  }
   0x6   :  { %s1275_s23 = smov 0   ;;  %s1277_s24 = smov 0  }
   0x7   :  { %s1279_s25 = smov 0   ;;  %s1281_s26 = smov 0  }
   0x8   :  { %s1283_s27 = smov 0   ;;  %s1285_s28 = smov 0  }
   0x9 LB: > { %s936_s29 = sadd.s32 4294967295, %s1227_s28   ;;  %s937_s30 = sadd.s32 4294967294, %s1227_s28   ;;  %s1227_s28 = sphi %s1285_s28, %s22_s28   ;;  %s1223_s27 = sphi %s1283_s27, %s1553_s27   ;;  %s1219_s26 = sphi %s1281_s26, %s1552_s26   ;;  %s1215_s25 = sphi %s1279_s25, %s1551_s25   ;;  %s1211_s24 = sphi %s1277_s24, %s1550_s24   ;;  %s1207_s23 = sphi %s1275_s23, %s1549_s23   ;;  %s1203_s22 = sphi %s1273_s22, %s1548_s22   ;;  %s1199_s21 = sphi %s1271_s21, %s1547_s21  }
   0xa   : > { %s40_s7 = sadd.s32 1, %s1219_s26  ;;  %s48_s8 = sadd.s32 1, %s1223_s27 }
   0xb   : > { %p42_p0 = scmp.ge.s32.totalorder %s40_s7, 4  ;;  %s57_s9 = sadd.s32 1, %s1207_s23 }
   0xc   : > { %p64_p1 = scmp.ne.s32.totalorder %s1207_s23, %s1203_s22  ;;  %p65_p2 = scmp.eq.s32.totalorder %s1227_s28, 0 }
   0xd   : > { %s1555_s7 = smov (%p42_p0, %s40_s7), 0  ;;  %s1557_s8 = smov (!%p42_p0, %s48_s8), %s1223_s27 }
   0xe   : > { %1531 = sst [smem:[#allocation12_spill]] %s1555_s7  ;;  %p1322_p3 = por %p65_p2, %p64_p1 }
   0xf   : > { %p70_p4 = scmp.ne.s32.totalorder %s1203_s22, %s1199_s21  ;;  %p50_p5 = scmp.ge.s32.totalorder %s1557_s8, 2 }
  0x10   : > { %p71_p6 = scmp.eq.s32.totalorder %s936_s29, 0  ;;  %p232_p7 = scmp.eq.s32.totalorder %s936_s29, 7 }
  0x11   : > { %p238_p8 = scmp.eq.s32.totalorder %s937_s30, 7  ;;  %s1559_s8 = smov (%p50_p5, %s1557_s8), 0 }
  0x12   : > { %1533 = sst [smem:[#allocation13_spill]] %s1559_s8  ;;  %p1330_p9 = por %p71_p6, %p70_p4 }
  0x13   : > { %p1334_p10 = por %p232_p7, %p64_p1  ;;  %s52_s13 = ssub.s32 %s1223_s27, %s1559_s8 }
  0x14   : > { %p1340_p11 = por %p238_p8, %p70_p4  ;;  %p55_p12 = scmp.eq.s32.totalorder %s52_s13, 0 }
  0x15   : > { %s1535_s12 = scalar_select %p1334_p10, 1, 0 }
  0x16   : > { %s1536_s14 = scalar_select %p1340_p11, 1, 0 }
  0x17   : > { %p1018_p13 = scmp.lt.s32.totalorder %s1227_s28, 8  ;;  %s258_s15 = sand.u32 1, %s1207_s23  }
  0x18   : > { %s1347_s16 = scalar_select %p55_p12, %s1207_s23, %s57_s9  }
  0x19   : > { %s940_s17 = sshll.u32 %s258_s15, 2  ;;  %s941_s18 = sshll.u32 %s1223_s27, 6 }
  0x1a   : > { %s1537_s0 = sld [smem:[#allocation14_spill]]  ;;  %s262_s30 = scalar_lea.vmem [#allocation6], %s940_s17 }
  0x1b   : > { %s270_s8 = sshll.u32 %s262_s30, 4  ;;  %p1359_p0 = pnand %p1018_p13, %p1322_p3  ;;  %s1355_s8 = int_to_ptr.vmem [resolvable:$true] %s270_s8 }
  0x1c   : > { %s259_s9 = scalar_lea.sflag [#allocation7], %s258_s15 }
  0x1d   : > { %p1101_p5 = pneg %p1359_p0 }
  0x20   : > { %s1353_s29 = scalar_lea.hbm %s1537_s0, %s941_s18  ;;  %s1104_s10 = scalar_lea.hbm %s1537_s0, 128 }
  0x21   : > { %s1099_s18 = scalar_lea.hbm %s1353_s29, 64  ;;  %p1105_p3 = scmp.lt.u32.totalorder %s1353_s29, %s1537_s0 }
  0x22   : > { %p1100_p4 = scmp.ne.s32.totalorder %s1353_s29, %s1099_s18  ;;  %p1106_p8 = scmp.lt.u32.totalorder %s1104_s10, %s1099_s18 }
  0x23   : > { %p1108_p13 = scmp.lt.u32.totalorder %s1099_s18, %s1353_s29 }
  0x24   : > { %p1102_p6 = pnand %p1101_p5, %p1100_p4  ;;  %p1107_p12 = por %p1106_p8, %p1105_p3 }
  0x26   : > { %p1103_p7 = pneg %p1102_p6  ;;  %p1109_p1 = por %p1108_p13, %p1107_p12 }
  0x28   : > { %p1110_p2 = pnand %p1109_p1, %p1103_p7 }
  0x2a   : > { %1113 = shalt.err (!%p1110_p2)
}
  0x2b   : > { %s1114_s15 = scalar_lea.vmem %s1355_s8, 64  ;;  %s1229_s17 = smov [#allocation6]  }
  0x2c   : > { %p1115_p4 = scmp.ne.s32.totalorder %s1355_s8, %s1114_s15  ;;  %s1119_s19 = sshll.u32 %s1229_s17, 4  ;;  %s1120_s19 = int_to_ptr.vmem [resolvable:$false] %s1119_s19 }
  0x2d   : > { %s1121_s20 = scalar_lea.vmem %s1120_s19, 128  ;;  %p1122_p10 = scmp.lt.s32.totalorder %s1355_s8, %s1120_s19 }
  0x2e   : > { %p1117_p6 = pnand %p1115_p4, %p1101_p5  ;;  %p1123_p3 = scmp.lt.s32.totalorder %s1121_s20, %s1114_s15 }
  0x30   : > { %p1118_p11 = pneg %p1117_p6  ;;  %p1124_p8 = por %p1123_p3, %p1122_p10 }
  0x32   : > { %p1125_p12 = pnand %p1124_p8, %p1118_p11 }
  0x34   : > { %1128 = shalt.err (!%p1125_p12)
}
  0x35   : > { %1013 = dma.hbm_to_vmem [thread:$0]  (!%p1359_p0), %s1353_s29, 64, %s1355_s8, %s259_s9  }
  0x36   : > { %p1539_p1 = scmp.lt.s32.totalorder %s1227_s28, 9  ;;  %p1540_p2 = scmp.ge.s32.totalorder %s1227_s28, 1 }
  0x38   : > { %p325_p5 = pnand %p1540_p2, %p1539_p1 }
  0x39   : > { %s1395_s18 = sand.u32 (!%p325_p5), 1, %s1203_s22  }
  0x3a   : > { %328 = sbr.rel (%p325_p5) target bundleno = 1353 (0x549), region = 44  ;;  %s943_s10 = sshll.u32 (!%p325_p5), %s1395_s18, 2 }
  0x3b   : > { %s331_s30 = scalar_lea.sflag (!%p325_p5), [#allocation7], %s1395_s18  ;;  %s1399_s15 = scalar_lea.vmem (!%p325_p5), [#allocation6], %s943_s10 }
  0x41   : > { %1190 = dma.done.wait (%p1330_p9), %s331_s30, 64  }
  0x42   : > { %1192 = vsyncadd (%p1330_p9), %s331_s30, 4294967232  ;;  %p415_p10 = scmp.lt.s32.totalorder %s1211_s24, 3  ;;  %v1230_v0 = vmov 0.0   ;;  %s949_s29 = sshll.u32 %s1211_s24, 1  ;;  %vm1231_vm0 = vmmov 0   ;;  %vm436_vm1 = vcmask 261120  }
  0x43   : > { %976 = vmatprep.subr.bf16.mxu0 %v1230_v0  ;;  %982 = vmatprep.subr.bf16.mxu1 %v1230_v0  ;;  %p420_p9 = scmp.lt.s32.totalorder %s949_s29, 7  ;;  %p396_p11 = scmp.lt.s32.totalorder %s1215_s25, 1  ;;  %v434_v5 = vld [vmem:[%s1399_s15] sm:$0xf]  ;;  %vm490_vm2 = vcmask 64512   ;;  %vm485_vm3 = vcmask 60416  }
  0x44   : > { %s1409_s13 = scalar_select %p415_p10, %s1211_s24, 3  ;;  %978 = vmatprep.mubr.msk.bf16.mxu0 %vm1231_vm0, %v1230_v0  ;;  %984 = vmatprep.mubr.msk.bf16.mxu1 %vm1231_vm0, %v1230_v0  ;;  %491 = vst.msk [vmem:[#allocation5] sm:$0xff] %vm490_vm2, %v1230_v0  ;;  %vm487_vm4 = vcmask 7168   ;;  %v1233_v20 = vmov -inf   ;;  %vm605_vm5 = vcmask 130048   ;;  %v1234_v29 = vmov 0  }
  0x45   : > { %s1561_s29 = smov (!%p420_p9, %s949_s29), 7  ;;  %488 = vst.msk [vmem:[#allocation3] sm:$0xff] %vm487_vm4, %v1233_v20  ;;  %489 = vst.msk [vmem:[#allocation4] sm:$0xff] %vm487_vm4, %v1230_v0  ;;  %1089 = vset.pattern.permute.xlu0 %v1234_v29  ;;  %1090 = vset.pattern.permute.xlu1 %v1234_v29  ;;  %vm704_vm6 = vcmask 1043456   ;;  %p959_p0 = scmp.ne.s32.totalorder %s1211_s24, 0 }
  0x46   : > { %s1529_s11 = sshll.u32 %s1409_s13, 2  ;;  %s950_s10 = sshll.u32 %s1561_s29, 2 }
  0x47   : > { %s418_s19 = scalar_lea.vmem %s1523_s3, %s1529_s11  ;;  %s423_s0 = scalar_lea.vmem %s1524_s4, %s950_s10 }
  0x48   : > { %v435_v1 = vld [vmem:[%s418_s19] sm:$0xf]  ;;  %s1421_s20 = scalar_select %p396_p11, %s1215_s25, 1 }
  0x49   : > { %v441_v2 = vsel %vm436_vm1, %v435_v1, 0  ;;  %v1091_v3 = vld [vmem:[%s423_s0] sm:$0xff]   ;;  %s1232_s0 = smov 120  }
  0x4a   : > { %977 = vmatpush3.bf16.xpose.msra.mxu0 %v441_v2  ;;  %s965_s7 = sshll.u32 %s1421_s20, 3  ;;  %v511_v4 = vsel %vm436_vm1, %v1091_v3, 0 }
  0x4b   : > { %s403_s11 = scalar_lea.vmem %s1521_s1, %s965_s7  ;;  %988 = vmatprep.subr.bf16.mxu0 %v1230_v0  ;;  %983 = vmatpush3.bf16.xpose.msra.mxu1 %v511_v4  ;;  %s414_s29 = scalar_lea.vmem %s1522_s2, %s965_s7  ;;  %v629_v50 = vld [vmem:[#allocation5] sm:$0xff] }
  0x4c   : > { %994 = vmatprep.subr.bf16.mxu1 %v1230_v0  ;;  %v1092_v6 = vld [vmem:[%s403_s11] sm:$0xff]   ;;  %s1541_s7 = sshll.u32 %s1409_s13, 2  ;;  %v621_v44 = vld [vmem:[#allocation4] sm:$0xff]  ;;  %s1542_s13 = sshll.u32 %s1395_s18, 3 }
  0x4d   : > { %v556_v22 = vld [vmem:[%s414_s29] sm:$0xff]  ;;  %s428_s20 = scalar_lea.vmem %s1525_s5, %s1541_s7  ;;  %s394_s10 = scalar_lea.vmem [#allocation9], %s1542_s13 }
  0x4e   : > { %v604_v30 = vld [vmem:[#allocation3] sm:$0xff]  ;;  %v700_v42 = vld [vmem:[%s428_s20] sm:$0xf] }
  0x4f   : > { %v706_v43 = vsel %vm704_vm6, %v700_v42, 0 }
  0x51   : > { %979 = vmatmul.mubr.msk.bf16.vlgmr.msra.gmra.mrb[0].mxu0 %vm436_vm1, %v434_v5 }
  0x52   : > { %990 = vmatprep.mubr.msk.bf16.mxu0 %vm1231_vm0, %v1230_v0  ;;  %985 = vmatmul.mubr.msk.bf16.vlgmr.msra.gmra.mrb[0].mxu1 %vm436_vm1, %v1092_v6 }
  0x53   : > { %996 = vmatprep.mubr.msk.bf16.mxu1 %vm1231_vm0, %v1230_v0 }
 0x124   : > { %v477_v7 = vpop.f32.mrb[0].mxu0 }
 0x125   : > { %v483_v8 = vmul.f32 0.35355338, %v477_v7  ;;  %v980_v9 = vpop.f32.mrb[1].mxu0  ;;  %v547_v13 = vpop.f32.mrb[0].mxu1 }
 0x126   : > { %v480_v10 = vpop.f32.mrb[2].mxu0  ;;  %v986_v14 = vpop.f32.mrb[1].mxu1 }
 0x127   : > { %v484_v11 = vpack.c.bf16 %v483_v8, %v483_v8  ;;  %v981_v12 = vpop.f32.mrb[3].mxu0  ;;  %v550_v15 = vpop.f32.mrb[2].mxu1 }
 0x128   : > { %v554_v16 = vpack.c.bf16 %v550_v15, %v547_v13  ;;  %v987_v17 = vpop.f32.mrb[3].mxu1 }
 0x129   : > { %486 = vst.msk [vmem:[#allocation2] sm:$0xf] %vm485_vm3, %v484_v11 }
 0x12a   : > { %v562_v18 = vsel %vm490_vm2, %v554_v16, 0  ;;  %638 = vrot.lane.b32.xlu1 %v554_v16, %s1232_s0 }
 0x12b   : > { %989 = vmatpush3.bf16.xpose.msra.mxu0 %v562_v18 }
 0x12c   : > { %1000 = vmatprep.subr.bf16.mxu0 %v1230_v0 }
 0x130   : > { %v555_v19 = vld [vmem:[#allocation2] sm:$0xf] }
 0x132   : > { %991 = vmatmul.mubr.msk.bf16.vlgmr.msra.gmra.mrb[4].mxu0 %vm490_vm2, %v555_v19 }
 0x133   : > { %1002 = vmatprep.mubr.msk.bf16.mxu0 %vm1231_vm0, %v1230_v0  ;;  %1001 = vmatpush3.bf16.msra.mxu0 %v706_v43 }
 0x19c   : > { %v639_v21 = vpop.permute.xlu1 %638 }
 0x19d   : > { %995 = vmatpush3.bf16.msra.mxu1 %v639_v21 }
 0x205   : > { %v598_v23 = vpop.f32.mrb[4].mxu0 }
 0x206   : > { %v599_v24 = vadd.f32 %v598_v23, %v556_v22  ;;  %v992_v25 = vpop.f32.mrb[5].mxu0 }
 0x207   : > { %v601_v26 = vpop.f32.mrb[6].mxu0 }
 0x208   : > { %v993_v27 = vpop.f32.mrb[7].mxu0  ;;  %v606_v28 = vsel %vm605_vm5, %v599_v24, -inf }
 0x209   : > { %607 = vmax.xlane.f32.xlu0 %v606_v28 }
 0x296   : > { %v608_v31 = vpop.xlane.xlu0 %607 }
 0x297   : > { %v609_v32 = vmax.f32 %v604_v30, %v608_v31 }
 0x299   : > { %v610_v33 = vsub.f32 %v604_v30, %v609_v32  ;;  %686 = vst.msk [vmem:[#allocation3] sm:$0xff] %vm487_vm4, %v609_v32  ;;  %615 = vperm.xlu0 %1089, %v609_v32  }
 0x29b   : > { %v611_v40 = vmul.f32 1.442695, %v610_v33 }
 0x318   : > { %v616_v34 = vpop.permute.xlu0 %615 }
 0x319   : > { %v618_v35 = vsub.f32 %v599_v24, %v616_v34 }
 0x31b   : > { %v619_v36 = vmul.f32 1.442695, %v618_v35 }
 0x31d   : > { %1093 = vpow2.f32 %v619_v36 }
 0x31e   : > { %1095 = vpow2.f32 %v611_v40 }
 0x327   : > { %v1094_v37 = vpop.eup %1093 }
 0x328   : > { %v623_v38 = vsel %vm605_vm5, %v1094_v37, 0.0  ;;  %v636_v39 = vpack.c.bf16 %v1094_v37, %v1094_v37  ;;  %v1096_v41 = vpop.eup %1095 }
 0x329   : > { %624 = vadd.xlane.f32.xlu1 %v623_v38  ;;  %v622_v45 = vmul.f32 %v1096_v41, %v621_v44 }
 0x32a   : > { %997 = vmatmul.mubr.msk.bf16.vlgmr.msra.gmra.mrb[4].mxu1 %vm605_vm5, %v636_v39 }
 0x33a   : > { %632 = vperm.xlu1 %1090, %v1096_v41  }
 0x3b6   : > { %v625_v46 = vpop.xlane.xlu1 %624 }
 0x3b7   : > { %v626_v47 = vadd.f32 %v625_v46, %v622_v45 }
 0x3b9   : > { %628 = vst.msk [vmem:[#allocation4] sm:$0xff] %vm487_vm4, %v626_v47 }
 0x3ba   : > { %v633_v51 = vpop.permute.xlu1 %632 }
 0x3bb   : > { %v635_v52 = vmul.f32 %v633_v51, %v629_v50 }
 0x3c0   : > { %v691_v48 = vld [vmem:[#allocation4] sm:$0xff] }
 0x3c1   : > { %1097 = vrcp.f32 %v691_v48 }
 0x3cb   : > { %v1098_v49 = vpop.eup %1097 }
 0x3cc   : > { %695 = vperm.xlu0 %1089, %v1098_v49  }
 0x3fd   : > { %v678_v53 = vpop.f32.mrb[4].mxu1 }
 0x3fe   : > { %v684_v54 = vadd.f32 %v678_v53, %v635_v52  ;;  %v998_v55 = vpop.f32.mrb[5].mxu1 }
 0x3ff   : > { %v681_v56 = vpop.f32.mrb[6].mxu1 }
 0x400   : > { %685 = vst.msk [vmem:[#allocation5] sm:$0xff] %vm490_vm2, %v684_v54  ;;  %v999_v57 = vpop.f32.mrb[7].mxu1 }
 0x407   : > { %v690_v58 = vld [vmem:[#allocation5] sm:$0xff] }
 0x44b   : > { %v696_v59 = vpop.permute.xlu0 %695 }
 0x44c   : > { %v698_v60 = vmul.f32 %v696_v59, %v690_v58 }
 0x44e   : > { %v699_v61 = vpack.c.bf16 %v698_v60, %v698_v60 }
 0x450   : > { %1003 = vmatmul.mubr.msk.bf16.vlgmr.msra.gmra.mrb[8].mxu0 %vm490_vm2, %v699_v61 }
 0x520   : > { %751 = sbr.rel (%p959_p0) target bundleno = 1319 (0x527), region = 60 }
 0x523   : > { %v742_v62 = vpop.f32.mrb[8].mxu0 }
 0x524   : > { %v1004_v63 = vpop.f32.mrb[9].mxu0  ;;  %752 = vst.msk [vmem:[%s394_s10] sm:$0xff] (!%p959_p0), %vm436_vm1, %v742_v62 }
 0x525   : > { %v745_v0 = vpop.f32.mrb[10].mxu0 }
 0x526   : > { %v1005_v1 = vpop.f32.mrb[11].mxu0 }
 0x527 PF: > { %p960_p7 = scmp.le.s32.totalorder %s1211_s24, 0 }
 0x529   : > { %756 = sbr.rel (%p960_p7) target bundleno = 1328 (0x530), region = 64 }
 0x52b   : > { %v757_v2 = vld [vmem:[%s394_s10] sm:$0xff] (!%p960_p7) }
 0x52c   : > { %v758_v3 = vadd.f32 (!%p960_p7), %v757_v2, %v742_v62 }
 0x52e   : > { %759 = vst.msk [vmem:[%s394_s10] sm:$0xff] (!%p960_p7), %vm436_vm1, %v758_v3 }
 0x530 PF: > { %s962_s30 = sshll.u32 %s1215_s25, 7  ;;  %s775_s15 = sshll.u32 %s394_s10, 4  ;;  %s776_s15 = int_to_ptr.vmem [resolvable:$true] %s775_s15 }
 0x531   : > { %s1472_s0 = scalar_lea.hbm %s1526_s6, %s962_s30  ;;  %s761_s8 = scalar_lea.sflag [#allocation8], %s1395_s18 }
 0x532   : > { %s1129_s29 = scalar_lea.vmem %s776_s15, 128  ;;  %p1543_p4 = scmp.ne.s32.totalorder %s1535_s12, 0 }
 0x533   : > { %p1130_p13 = scmp.ne.s32.totalorder %s776_s15, %s1129_s29  ;;  %s1235_s24 = smov [#allocation9]  }
 0x534   : > { %s1133_s7 = sshll.u32 %s1235_s24, 4  ;;  %s1134_s7 = int_to_ptr.vmem [resolvable:$false] %s1133_s7 }
 0x535   : > { %p1131_p6 = pnand %p1130_p13, %p1543_p4  ;;  %s1135_s11 = scalar_lea.vmem %s1134_s7, 256 }
 0x536   : > { %p1136_p8 = scmp.lt.s32.totalorder %s776_s15, %s1134_s7  ;;  %p1137_p12 = scmp.lt.s32.totalorder %s1135_s11, %s1129_s29 }
 0x537   : > { %p1132_p3 = pneg %p1131_p6 }
 0x538   : > { %p1138_p1 = por %p1137_p12, %p1136_p8 }
 0x53a   : > { %p1139_p2 = pnand %p1138_p1, %p1132_p3 }
 0x53c   : > { %1142 = shalt.err (!%p1139_p2)
}
 0x53d   : > { %s1143_s25 = scalar_lea.hbm %s1472_s0, 128  ;;  %s1147_s20 = scalar_lea.hbm %s1526_s6, 256 }
 0x53e   : > { %p1144_p5 = scmp.ne.s32.totalorder %s1472_s0, %s1143_s25  ;;  %p1148_p11 = scmp.lt.u32.totalorder %s1472_s0, %s1526_s6 }
 0x53f   : > { %p1149_p0 = scmp.lt.u32.totalorder %s1147_s20, %s1143_s25  ;;  %p1151_p13 = scmp.lt.u32.totalorder %s1143_s25, %s1472_s0 }
 0x540   : > { %p1145_p10 = pnand %p1144_p5, %p1543_p4 }
 0x541   : > { %p1150_p7 = por %p1149_p0, %p1148_p11 }
 0x542   : > { %p1146_p9 = pneg %p1145_p10 }
 0x543   : > { %p1152_p6 = por %p1151_p13, %p1150_p7 }
 0x545   : > { %p1153_p3 = pnand %p1152_p6, %p1146_p9 }
 0x547   : > { %1156 = shalt.err (!%p1153_p3)
}
 0x548   : > { %1008 = dma.vmem_to_hbm [thread:$0]  (%p1543_p4), %s776_s15, 128, %s1472_s0, %s761_s8  }
 0x549 PF: > { %p1019_p8 = scmp.ge.s32.totalorder %s1227_s28, 2  ;;  %s787_s30 = sand.u32 1, %s1199_s21  }
 0x54a   : > { %p1544_p12 = scmp.ne.s32.totalorder %s1536_s14, 0  ;;  %s788_s9 = scalar_lea.sflag [#allocation8], %s787_s30 }
 0x54c   : > { %p1015_p1 = pnand %p1019_p8, %p1544_p12 }
 0x54e   : > { %1194 = dma.done.wait (!%p1015_p1), %s788_s9, 128  }
 0x54f   : > { %1196 = vsyncadd (!%p1015_p1), %s788_s9, 4294967168  ;;  %s22_s28 = sadd.s32 1, %s1227_s28   ;;  %s1545_s12 = sld [smem:[#allocation12_spill]] }
 0x550   : > { %p19_p2 = scmp.ge.s32.totalorder %s22_s28, 10   ;;  %s1546_s17 = sld [smem:[#allocation13_spill]] }
 0x551   : > { %s1547_s21 = smov %s1203_s22  ;;  %s1548_s22 = smov %s1207_s23 }
 0x552   : > { %s1549_s23 = smov %s1347_s16  ;;  %s1550_s24 = smov %s1219_s26 }
 0x553   : > { %s1551_s25 = smov %s1223_s27  ;;  %21 = sbr.rel (!%p19_p2) target bundleno = 9 (0x9), region = 120 }
 0x555   : > { %s1552_s26 = smov %s1545_s12 }
 0x556   : > { %s1553_s27 = smov %s1546_s17 }
 0x55a   :  { %793 = vsyncpa [#allocation7], 1 }
 0x55b   :  { %795 = vsyncpa [#allocation7 + $0x1], 1 }
 0x55c   :  { %796 = vsyncpa [#allocation8], 1 }
 0x55d   :  { %798 = vsyncpa [#allocation8 + $0x1], 1 }

</bundles_post_ra>
